<compile_context>
chip_gen: v7x
topology: tpu7x:2x2x1
jax: 0.10.0
libtpu: 0.0.40
codegen_flags: <defaults>
</compile_context>

<pallas_src>
import jax
import jax.numpy as jnp
from jax.experimental import pallas as pl
from jax.experimental.pallas import tpu as pltpu


# ----------------------------- Pallas kernel ------------------------------ #
def qnet_kernel(
    slab_ref,   # (TB, K*F)   per-asset features, flat row-major (free reshape)
    port_ref,   # (TB, K+1)   portfolio vector
    ws1bd_ref,  # (K*F, K*H)  block-diagonal score_net layer-1 weight
    bs1_ref,    # (1, K*H)    K-tiled score_net layer-1 bias (f32)
    wcat_ref,   # (K*H, 128)  folded ws2 (x) layer1 score-rows
    w1p_ref,    # (K+1, 128)  layer1 rows that multiply the portfolio
    b1_ref,     # (1, 128)    layer1 bias with bs2 folded in (f32)
    w2_ref,     # (128, 64)
    b2_ref,     # (1, 64)     (f32)
    w3_ref,     # (64, NPAD)  layer3 weight, zero-padded to 128 lanes
    b3_ref,     # (1, NPAD)   layer3 bias, zero-padded (f32)
    out_ref,    # (TB, NPAD)  f32
):
    # --- score_net layer-1 for all K assets in one matmul --------------------
    h = jnp.dot(slab_ref[...], ws1bd_ref[...],
                preferred_element_type=jnp.float32)                 # (TB, K*H)
    h = jnp.maximum(h + bs1_ref[...], 0.0)

    # --- layer1: folded score path + portfolio path ---------------------------
    h1 = jnp.dot(h.astype(wcat_ref.dtype), wcat_ref[...],
                 preferred_element_type=jnp.float32)                 # (TB, 128)
    h1 = h1 + jnp.dot(port_ref[...], w1p_ref[...],
                      preferred_element_type=jnp.float32)
    h1 = jnp.maximum(h1 + b1_ref[...], 0.0)

    # --- layer2 -> ReLU -> layer3 (lane-dense padded output) -----------------
    h2 = jnp.dot(h1.astype(w2_ref.dtype), w2_ref[...],
                 preferred_element_type=jnp.float32) + b2_ref[...]   # (TB, 64)
    h2 = jnp.maximum(h2, 0.0)
    q = jnp.dot(h2.astype(w3_ref.dtype), w3_ref[...],
                preferred_element_type=jnp.float32) + b3_ref[...]    # (TB, NPAD)
    out_ref[...] = q.astype(out_ref.dtype)


# ------------------------------ Wrapper ----------------------------------- #
def qnet_forward(s1_tensor, portfolio, params, *, block_b=4096,
                 compute_dtype=jnp.bfloat16, slice_output=True):
    B, K, F = s1_tensor.shape
    H = params["ws1"].shape[1]
    n1 = params["w1"].shape[1]                    # 128
    n2 = params["w2"].shape[1]                    # 64
    n_out = params["w3"].shape[1]                 # 5 ** K
    n_pad = pl.cdiv(n_out, 128) * 128             # lane-dense output width
    cd = compute_dtype
    f32 = jnp.float32

    # ---- fold score_net into dense layer-1 weights (done once, at trace time)
    w1s = params["w1"][:K, :]                     # (K, n1)   rows hit by scores
    w1p = params["w1"][K:, :].astype(cd)          # (K+1, n1) rows hit by portfolio

    # Block-diagonal score_net layer-1 weight: (K*F, K*H)
    ws1_bd = jnp.zeros((K * F, K * H), f32)
    for k in range(K):
        ws1_bd = ws1_bd.at[k * F:(k + 1) * F, k * H:(k + 1) * H].set(params["ws1"])
    ws1_bd = ws1_bd.astype(cd)
    bs1_tiled = jnp.tile(params["bs1"].astype(f32), (1, K))          # (1, K*H)

    # Wcat[k*H:(k+1)*H, :] = ws2 @ w1s[k:k+1]  -> (K*H, n1)
    wcat = jnp.einsum("h,kn->khn", params["ws2"][:, 0], w1s).reshape(K * H, n1)
    wcat = wcat.astype(cd)
    # bs2 folded into layer1 bias
    b1_eff = (params["b1"] + params["bs2"][0, 0] * w1s.sum(axis=0, keepdims=True)
              ).astype(f32)

    # Zero-pad layer3 so padded lanes stay zero and the store is unmasked.
    w3p = jnp.zeros((n2, n_pad), f32).at[:, :n_out].set(params["w3"]).astype(cd)
    b3p = jnp.zeros((1, n_pad), f32).at[:, :n_out].set(params["b3"])
    w2 = params["w2"].astype(cd)
    b2 = params["b2"].astype(f32)

    # ---- batch tiling: multiple of 16 sublanes, >= 2 tiles (v7x megacore) ---
    align = 16
    half_b = pl.cdiv(pl.cdiv(B, 2), align) * align
    tb = max(align, (min(int(block_b), int(half_b)) // align) * align)
    Bp = pl.cdiv(B, tb) * tb
    num_tiles = Bp // tb

    # ---- activations: free row-major reshape, no transpose copy ------------
    slab = s1_tensor.reshape(B, K * F).astype(cd)                    # (B, K*F)
    port = portfolio.astype(cd)
    if Bp != B:
        slab = jnp.pad(slab, ((0, Bp - B), (0, 0)))
        port = jnp.pad(port, ((0, Bp - B), (0, 0)))

    resident = lambda shape: pl.BlockSpec(shape, lambda i: (0, 0))
    # TODO(synk): pipeline_mode=pl.Buffered(1) on the resident weight specs
    # would drop their double-buffers; skipped to keep lowering conservative.

    # Advisory cost estimate for the XLA scheduler.
    act_bytes = jnp.dtype(cd).itemsize
    flops = 2 * Bp * (K * F * K * H + K * H * n1 + (K + 1) * n1
                      + n1 * n2 + n2 * n_pad)
    bytes_accessed = (
        act_bytes * (Bp * K * F + Bp * (K + 1))
        + 4 * Bp * n_pad
        + act_bytes * (K * F * K * H + K * H * n1 + (K + 1) * n1
                       + n1 * n2 + n2 * n_pad)
        + 4 * (K * H + n1 + n2 + n_pad)
    )

    out = pl.pallas_call(
        qnet_kernel,
        out_shape=jax.ShapeDtypeStruct((Bp, n_pad), jnp.float32),
        grid_spec=pltpu.PrefetchScalarGridSpec(
            num_scalar_prefetch=0,
            grid=(num_tiles,),
            in_specs=[
                # activations: tiled over the batch grid axis
                pl.BlockSpec((tb, K * F), lambda i: (i, 0)),
                pl.BlockSpec((tb, K + 1), lambda i: (i, 0)),
                # weights/biases: resident (constant index_map -> DMA'd once)
                resident((K * F, K * H)),
                resident((1, K * H)),
                resident((K * H, n1)),
                resident((K + 1, n1)),
                resident((1, n1)),
                resident((n1, n2)),
                resident((1, n2)),
                resident((n2, n_pad)),
                resident((1, n_pad)),
            ],
            out_specs=pl.BlockSpec((tb, n_pad), lambda i: (i, 0)),
        ),
        compiler_params=pltpu.CompilerParams(
            dimension_semantics=("parallel",),   # shard batch tiles across TCs
        ),
        cost_estimate=pl.CostEstimate(
            flops=int(flops), transcendentals=0, bytes_accessed=int(bytes_accessed)
        ),
    )(
        slab, port,
        ws1_bd, bs1_tiled, wcat, w1p, b1_eff, w2, b2, w3p, b3p,
    )

    if slice_output:
        if Bp != B or n_pad != n_out:
            out = out[:B, :n_out]
        return out
    # padded buffer: valid data lives in out[:B, :n_out]; padded lanes are 0.
    return out


# -------------------------- Parameter creation ----------------------------- #
def make_params(key, K, F, H=32):
    ks = jax.random.split(key, 8)
    in1 = 1 * K + 1 + K          # 2K + 1
    out3 = 5 ** K

    def unif(k, shape, fan_in):
        bound = 1.0 / jnp.sqrt(float(fan_in))
        return jax.random.uniform(k, shape, jnp.float32, -bound, bound)

    return {
        # score_net: Linear(F,H) -> ReLU -> Linear(H,1)
        "ws1": 0.1 * jax.random.normal(ks[0], (F, H), jnp.float32),
        "bs1": unif(ks[1], (1, H), F),
        "ws2": 0.1 * jax.random.normal(ks[2], (H, 1), jnp.float32),
        "bs2": unif(ks[3], (1, 1), H),
        # Qnet layers: weights constant 0.01 (nn.init.constant_), biases
        # deterministic uniform (PyTorch default-style range).
        "w1": jnp.full((in1, 128), 0.01, jnp.float32),
        "b1": unif(ks[4], (1, 128), in1),
        "w2": jnp.full((128, 64), 0.01, jnp.float32),
        "b2": unif(ks[5], (1, 64), 128),
        "w3": jnp.full((64, out3), 0.01, jnp.float32),
        "b3": unif(ks[6], (1, out3), 64),
    }


# -------------------------- Pure-JAX reference ----------------------------- #
def qnet_reference(s1, port, p):
    K = s1.shape[1]
    scores = []
    for i in range(K):
        h = jnp.maximum(s1[:, i, :] @ p["ws1"] + p["bs1"], 0.0)
        scores.append(h @ p["ws2"] + p["bs2"])
    x = jnp.concatenate(scores + [port], axis=-1)
    h1 = jnp.maximum(x @ p["w1"] + p["b1"], 0.0)
    h2 = jnp.maximum(h1 @ p["w2"] + p["b2"], 0.0)
    return h2 @ p["w3"] + p["b3"]


if __name__ == "__main__":
    # Small deterministic example.  B=24 with the default tiling yields tb=16,
    # a 2-tile "parallel" grid (exercises the v7x megacore path) and batch
    # padding (Bp=32).
    B, K, F, H = 24, 3, 16, 32

    key = jax.random.PRNGKey(0)
    k_s1, k_port, k_params = jax.random.split(key, 3)

    s1_tensor = jax.random.normal(k_s1, (B, K, F), jnp.float32)
    portfolio = jax.random.normal(k_port, (B, K + 1), jnp.float32)
    params = make_params(k_params, K, F, H)

    # Default path: bf16 MXU operands, f32 accumulate.
    q = qnet_forward(s1_tensor, portfolio, params)
    # f32 MXU path: tight check of the folded (block-diag / Wcat / bs2) algebra.
    q32 = qnet_forward(s1_tensor, portfolio, params, compute_dtype=jnp.float32)
    jax.block_until_ready((q, q32))

    q_ref = qnet_reference(s1_tensor, portfolio, params)
    assert q.shape == (B, 5 ** K)
    assert jnp.allclose(q32, q_ref, atol=1e-4, rtol=1e-4)
    assert jnp.allclose(q, q_ref, atol=2e-2, rtol=2e-2)

    print("KERNEL_OK")
</pallas_src>

<mosaic_0001>
module attributes {stable_mosaic.version = 11 : i64} {
  func.func @qnet_kernel(%arg0: i32, %arg1: memref<16x48xbf16, #tpu.memory_space<vmem>>, %arg2: memref<16x4xbf16, #tpu.memory_space<vmem>>, %arg3: memref<48x96xbf16, #tpu.memory_space<vmem>>, %arg4: memref<1x96xf32, #tpu.memory_space<vmem>>, %arg5: memref<96x128xbf16, #tpu.memory_space<vmem>>, %arg6: memref<4x128xbf16, #tpu.memory_space<vmem>>, %arg7: memref<1x128xf32, #tpu.memory_space<vmem>>, %arg8: memref<128x64xbf16, #tpu.memory_space<vmem>>, %arg9: memref<1x64xf32, #tpu.memory_space<vmem>>, %arg10: memref<64x128xbf16, #tpu.memory_space<vmem>>, %arg11: memref<1x128xf32, #tpu.memory_space<vmem>>, %arg12: memref<16x128xf32, #tpu.memory_space<vmem>>) attributes {dimension_semantics = [#tpu.dimension_semantics<parallel>], iteration_bounds = array<i64: 2>, scalar_prefetch = 0 : i64, scratch_operands = 0 : i64, tpu.core_type = #tpu.core_type<tc>, window_params = [{transform_indices = @transform_0, window_bounds = array<i64: 16, 48>}, {transform_indices = @transform_1, window_bounds = array<i64: 16, 4>}, {pipeline_mode = #tpu.pipeline_mode<synchronous>, transform_indices = @transform_2, window_bounds = array<i64: 48, 96>}, {pipeline_mode = #tpu.pipeline_mode<synchronous>, transform_indices = @transform_3, window_bounds = array<i64: 1, 96>}, {pipeline_mode = #tpu.pipeline_mode<synchronous>, transform_indices = @transform_4, window_bounds = array<i64: 96, 128>}, {pipeline_mode = #tpu.pipeline_mode<synchronous>, transform_indices = @transform_5, window_bounds = array<i64: 4, 128>}, {pipeline_mode = #tpu.pipeline_mode<synchronous>, transform_indices = @transform_6, window_bounds = array<i64: 1, 128>}, {pipeline_mode = #tpu.pipeline_mode<synchronous>, transform_indices = @transform_7, window_bounds = array<i64: 128, 64>}, {pipeline_mode = #tpu.pipeline_mode<synchronous>, transform_indices = @transform_8, window_bounds = array<i64: 1, 64>}, {pipeline_mode = #tpu.pipeline_mode<synchronous>, transform_indices = @transform_9, window_bounds = array<i64: 64, 128>}, {pipeline_mode = #tpu.pipeline_mode<synchronous>, transform_indices = @transform_10, window_bounds = array<i64: 1, 128>}, {transform_indices = @transform_11, window_bounds = array<i64: 16, 128>}]} {
    %c0 = arith.constant 0 : index
    %c0_0 = arith.constant 0 : index
    %0 = vector.load %arg1[%c0, %c0_0] : memref<16x48xbf16, #tpu.memory_space<vmem>>, vector<16x48xbf16>
    %c0_1 = arith.constant 0 : index
    %c0_2 = arith.constant 0 : index
    %1 = vector.load %arg3[%c0_1, %c0_2] : memref<48x96xbf16, #tpu.memory_space<vmem>>, vector<48x96xbf16>
    %cst = arith.constant dense<0.000000e+00> : vector<16x96xf32>
    %2 = tpu.matmul %0, %1, %cst {dimension_numbers = #tpu.dot_dimension_numbers<[1], [0], [0], [1], [0, 0, 1, 1], [], []>} : vector<16x48xbf16>, vector<48x96xbf16>, vector<16x96xf32> -> vector<16x96xf32>
    %c0_3 = arith.constant 0 : index
    %c0_4 = arith.constant 0 : index
    %3 = vector.load %arg4[%c0_3, %c0_4] : memref<1x96xf32, #tpu.memory_space<vmem>>, vector<1x96xf32>
    %4 = vector.broadcast %3 : vector<1x96xf32> to vector<16x96xf32>
    %5 = arith.addf %2, %4 : vector<16x96xf32>
    %cst_5 = arith.constant 0.000000e+00 : f32
    %6 = vector.broadcast %cst_5 : f32 to vector<16x96xf32>
    %7 = arith.maximumf %5, %6 : vector<16x96xf32>
    %8 = arith.truncf %7 : vector<16x96xf32> to vector<16x96xbf16>
    %c0_6 = arith.constant 0 : index
    %c0_7 = arith.constant 0 : index
    %9 = vector.load %arg5[%c0_6, %c0_7] : memref<96x128xbf16, #tpu.memory_space<vmem>>, vector<96x128xbf16>
    %cst_8 = arith.constant dense<0.000000e+00> : vector<16x128xf32>
    %10 = tpu.matmul %8, %9, %cst_8 {dimension_numbers = #tpu.dot_dimension_numbers<[1], [0], [0], [1], [0, 0, 1, 1], [], []>} : vector<16x96xbf16>, vector<96x128xbf16>, vector<16x128xf32> -> vector<16x128xf32>
    %c0_9 = arith.constant 0 : index
    %c0_10 = arith.constant 0 : index
    %11 = vector.load %arg2[%c0_9, %c0_10] : memref<16x4xbf16, #tpu.memory_space<vmem>>, vector<16x4xbf16>
    %c0_11 = arith.constant 0 : index
    %c0_12 = arith.constant 0 : index
    %12 = vector.load %arg6[%c0_11, %c0_12] : memref<4x128xbf16, #tpu.memory_space<vmem>>, vector<4x128xbf16>
    %cst_13 = arith.constant dense<0.000000e+00> : vector<16x128xf32>
    %13 = tpu.matmul %11, %12, %cst_13 {dimension_numbers = #tpu.dot_dimension_numbers<[1], [0], [0], [1], [0, 0, 1, 1], [], []>} : vector<16x4xbf16>, vector<4x128xbf16>, vector<16x128xf32> -> vector<16x128xf32>
    %14 = arith.addf %10, %13 : vector<16x128xf32>
    %c0_14 = arith.constant 0 : index
    %c0_15 = arith.constant 0 : index
    %15 = vector.load %arg7[%c0_14, %c0_15] : memref<1x128xf32, #tpu.memory_space<vmem>>, vector<1x128xf32>
    %16 = vector.broadcast %15 : vector<1x128xf32> to vector<16x128xf32>
    %17 = arith.addf %14, %16 : vector<16x128xf32>
    %cst_16 = arith.constant 0.000000e+00 : f32
    %18 = vector.broadcast %cst_16 : f32 to vector<16x128xf32>
    %19 = arith.maximumf %17, %18 : vector<16x128xf32>
    %20 = arith.truncf %19 : vector<16x128xf32> to vector<16x128xbf16>
    %c0_17 = arith.constant 0 : index
    %c0_18 = arith.constant 0 : index
    %21 = vector.load %arg8[%c0_17, %c0_18] : memref<128x64xbf16, #tpu.memory_space<vmem>>, vector<128x64xbf16>
    %cst_19 = arith.constant dense<0.000000e+00> : vector<16x64xf32>
    %22 = tpu.matmul %20, %21, %cst_19 {dimension_numbers = #tpu.dot_dimension_numbers<[1], [0], [0], [1], [0, 0, 1, 1], [], []>} : vector<16x128xbf16>, vector<128x64xbf16>, vector<16x64xf32> -> vector<16x64xf32>
    %c0_20 = arith.constant 0 : index
    %c0_21 = arith.constant 0 : index
    %23 = vector.load %arg9[%c0_20, %c0_21] : memref<1x64xf32, #tpu.memory_space<vmem>>, vector<1x64xf32>
    %24 = vector.broadcast %23 : vector<1x64xf32> to vector<16x64xf32>
    %25 = arith.addf %22, %24 : vector<16x64xf32>
    %cst_22 = arith.constant 0.000000e+00 : f32
    %26 = vector.broadcast %cst_22 : f32 to vector<16x64xf32>
    %27 = arith.maximumf %25, %26 : vector<16x64xf32>
    %28 = arith.truncf %27 : vector<16x64xf32> to vector<16x64xbf16>
    %c0_23 = arith.constant 0 : index
    %c0_24 = arith.constant 0 : index
    %29 = vector.load %arg10[%c0_23, %c0_24] : memref<64x128xbf16, #tpu.memory_space<vmem>>, vector<64x128xbf16>
    %cst_25 = arith.constant dense<0.000000e+00> : vector<16x128xf32>
    %30 = tpu.matmul %28, %29, %cst_25 {dimension_numbers = #tpu.dot_dimension_numbers<[1], [0], [0], [1], [0, 0, 1, 1], [], []>} : vector<16x64xbf16>, vector<64x128xbf16>, vector<16x128xf32> -> vector<16x128xf32>
    %c0_26 = arith.constant 0 : index
    %c0_27 = arith.constant 0 : index
    %31 = vector.load %arg11[%c0_26, %c0_27] : memref<1x128xf32, #tpu.memory_space<vmem>>, vector<1x128xf32>
    %32 = vector.broadcast %31 : vector<1x128xf32> to vector<16x128xf32>
    %33 = arith.addf %30, %32 : vector<16x128xf32>
    %c0_28 = arith.constant 0 : index
    %c0_29 = arith.constant 0 : index
    %34 = vector.load %arg12[%c0_28, %c0_29] : memref<16x128xf32, #tpu.memory_space<vmem>>, vector<16x128xf32>
    tpu.vector_store %arg12[%c0_28, %c0_29], %33 {strides = array<i32>} : memref<16x128xf32, #tpu.memory_space<vmem>>, vector<16x128xf32>,
    return
  }
  func.func @transform_0(%arg0: i32) -> (i32, i32) {
    %c0_i32 = arith.constant 0 : i32
    %c0_i32_0 = arith.constant 0 : i32
    return %arg0, %c0_i32 : i32, i32
  }
  func.func @transform_1(%arg0: i32) -> (i32, i32) {
    %c0_i32 = arith.constant 0 : i32
    %c0_i32_0 = arith.constant 0 : i32
    return %arg0, %c0_i32 : i32, i32
  }
  func.func @transform_2(%arg0: i32) -> (i32, i32) {
    %c0_i32 = arith.constant 0 : i32
    %c0_i32_0 = arith.constant 0 : i32
    %c0_i32_1 = arith.constant 0 : i32
    return %c0_i32, %c0_i32_0 : i32, i32
  }
  func.func @transform_3(%arg0: i32) -> (i32, i32) {
    %c0_i32 = arith.constant 0 : i32
    %c0_i32_0 = arith.constant 0 : i32
    %c0_i32_1 = arith.constant 0 : i32
    return %c0_i32, %c0_i32_0 : i32, i32
  }
  func.func @transform_4(%arg0: i32) -> (i32, i32) {
    %c0_i32 = arith.constant 0 : i32
    %c0_i32_0 = arith.constant 0 : i32
    %c0_i32_1 = arith.constant 0 : i32
    return %c0_i32, %c0_i32_0 : i32, i32
  }
  func.func @transform_5(%arg0: i32) -> (i32, i32) {
    %c0_i32 = arith.constant 0 : i32
    %c0_i32_0 = arith.constant 0 : i32
    %c0_i32_1 = arith.constant 0 : i32
    return %c0_i32, %c0_i32_0 : i32, i32
  }
  func.func @transform_6(%arg0: i32) -> (i32, i32) {
    %c0_i32 = arith.constant 0 : i32
    %c0_i32_0 = arith.constant 0 : i32
    %c0_i32_1 = arith.constant 0 : i32
    return %c0_i32, %c0_i32_0 : i32, i32
  }
  func.func @transform_7(%arg0: i32) -> (i32, i32) {
    %c0_i32 = arith.constant 0 : i32
    %c0_i32_0 = arith.constant 0 : i32
    %c0_i32_1 = arith.constant 0 : i32
    return %c0_i32, %c0_i32_0 : i32, i32
  }
  func.func @transform_8(%arg0: i32) -> (i32, i32) {
    %c0_i32 = arith.constant 0 : i32
    %c0_i32_0 = arith.constant 0 : i32
    %c0_i32_1 = arith.constant 0 : i32
    return %c0_i32, %c0_i32_0 : i32, i32
  }
  func.func @transform_9(%arg0: i32) -> (i32, i32) {
    %c0_i32 = arith.constant 0 : i32
    %c0_i32_0 = arith.constant 0 : i32
    %c0_i32_1 = arith.constant 0 : i32
    return %c0_i32, %c0_i32_0 : i32, i32
  }
  func.func @transform_10(%arg0: i32) -> (i32, i32) {
    %c0_i32 = arith.constant 0 : i32
    %c0_i32_0 = arith.constant 0 : i32
    %c0_i32_1 = arith.constant 0 : i32
    return %c0_i32, %c0_i32_0 : i32, i32
  }
  func.func @transform_11(%arg0: i32) -> (i32, i32) {
    %c0_i32 = arith.constant 0 : i32
    %c0_i32_0 = arith.constant 0 : i32
    return %arg0, %c0_i32 : i32, i32
  }
}

</mosaic_0001>

<bundles_post_ra>
// kernel: tpu_custom_call.1
= control target key start
LH: loop header
LB: loop body
LE: loop exit
PB: predicated region body
PF: predicated region fallthrough
CT: control target
= control target key end

     0   :  { %s1636_s0 = inlined_call_operand.hbm [shape: bf16[32,48], index: 0, kind: input, shape index: {}]   ;;  %s1637_s1 = inlined_call_operand.vmem [shape: bf16[32,4], index: 1, kind: input, shape index: {}]   ;;  %s1638_s2 = inlined_call_operand.vmem [shape: bf16[48,96], index: 2, kind: input, shape index: {}]   ;;  %s1639_s3 = inlined_call_operand.vmem [shape: f32[1,96], index: 3, kind: input, shape index: {}]   ;;  %s1640_s4 = inlined_call_operand.vmem [shape: bf16[96,128], index: 4, kind: input, shape index: {}]   ;;  %s1641_s5 = inlined_call_operand.vmem [shape: bf16[4,128], index: 5, kind: input, shape index: {}]   ;;  %s1642_s6 = inlined_call_operand.vmem [shape: f32[1,128], index: 6, kind: input, shape index: {}]   ;;  %s1643_s7 = inlined_call_operand.vmem [shape: bf16[128,64], index: 7, kind: input, shape index: {}]   ;;  %s1644_s8 = inlined_call_operand.vmem [shape: f32[1,64], index: 8, kind: input, shape index: {}]   ;;  %s1645_s9 = inlined_call_operand.vmem [shape: bf16[64,128], index: 9, kind: input, shape index: {}]   ;;  %s1646_s10 = inlined_call_operand.vmem [shape: f32[1,128], index: 10, kind: input, shape index: {}]   ;;  %s1647_s11 = inlined_call_operand.hbm [shape: f32[32,128], index: 11, kind: output, shape index: {}]  }
   0x1   :  { %1651 = sst [smem:[#allocation11_spill]] %s1636_s0 }
   0x2   :  { %16 = vsyncpa [#allocation3], 0 }
   0x3   :  { %18 = vsyncpa [#allocation3 + $0x1], 0 }
   0x4   :  { %19 = vsyncpa [#allocation4], 0 }
   0x5   :  { %21 = vsyncpa [#allocation4 + $0x1], 0  ;;  %s1359_s17 = smov 0   ;;  %s1361_s18 = smov 0  }
   0x6   :  { %s1363_s19 = smov 0   ;;  %s1365_s20 = smov 0  }
   0x7 LB: > { %1652 = sst [smem:[#allocation8_spill]] %s1281_s18  ;;  %s1380_s21 = sadd.s32 4294967295, %s1289_s20   ;;  %s1289_s20 = sphi %s1365_s20, %s1667_s20   ;;  %s1285_s19 = sphi %s1363_s19, %s1666_s19   ;;  %s1281_s18 = sphi %s1361_s18, %s1665_s18   ;;  %s1277_s17 = sphi %s1359_s17, %s1664_s17  }
   0x8   : > { %1653 = sst [smem:[#allocation9_spill]] %s1285_s19  ;;  %s978_s22 = sadd.s32 4294967294, %s1289_s20  }
   0x9   : > { %s1384_s23 = sadd.s32 1, %s1289_s20   ;;  %s34_s24 = sadd.s32 1, %s1285_s19 }
   0xa   : > { %s31_s25 = ssub.s32 %s1289_s20, %s1384_s23  ;;  %p41_p0 = scmp.ne.s32.totalorder %s1285_s19, %s1281_s18 }
   0xb   : > { %p32_p1 = scmp.eq.s32.totalorder %s31_s25, 0  ;;  %p42_p2 = scmp.eq.s32.totalorder %s1289_s20, 0 }
   0xc   : > { %p47_p3 = scmp.ne.s32.totalorder %s1281_s18, %s1277_s17  ;;  %p48_p4 = scmp.eq.s32.totalorder %s1380_s21, 0 }
   0xd   : > { %s1396_s26 = scalar_select %p32_p1, %s1285_s19, %s34_s24  }
   0xe   : > { %p1398_p5 = por %p42_p2, %p41_p0  ;;  %p1402_p6 = por %p48_p4, %p47_p3 }
   0xf   : > { %1654 = sst [smem:[#allocation10_spill]] %s1396_s26  ;;  %p286_p7 = scmp.eq.s32.totalorder %s1380_s21, 1 }
  0x10   : > { %p292_p8 = scmp.eq.s32.totalorder %s978_s22, 1  ;;  %p1130_p10 = scmp.lt.s32.totalorder %s1289_s20, 2 }
  0x11   : > { %p1409_p11 = por %p286_p7, %p41_p0  ;;  %s339_s12 = sand.u32 1, %s1285_s19  }
  0x12   : > { %p1413_p12 = por %p292_p8, %p47_p3  ;;  %s1025_s13 = sshll.u32 %s1289_s20, 7 }
  0x13   : > { %s1657_s29 = scalar_select %p1409_p11, 1, 0 }
  0x14   : > { %s1658_s30 = scalar_select %p1413_p12, 1, 0 }
  0x15   : > { %s981_s14 = sshll.u32 %s339_s12, 3  ;;  %s1659_s0 = sld [smem:[#allocation11_spill]] }
  0x16   : > { %s343_s22 = scalar_lea.vmem [#allocation2], %s981_s14  ;;  %p1426_p13 = pnand %p1130_p10, %p1398_p5 }
  0x17   : > { %s350_s25 = sshll.u32 %s343_s22, 4  ;;  %s1432_s19 = scalar_lea.sflag [#allocation3], %s339_s12  ;;  %s1430_s25 = int_to_ptr.vmem [resolvable:$true] %s350_s25 }
  0x18   : > { %p1195_p1 = pneg %p1426_p13 }
  0x1b   : > { %s1422_s24 = scalar_lea.hbm %s1659_s0, %s1025_s13  ;;  %s1198_s14 = scalar_lea.hbm %s1659_s0, 256 }
  0x1c   : > { %s1193_s15 = scalar_lea.hbm %s1422_s24, 128  ;;  %p1199_p4 = scmp.lt.u32.totalorder %s1422_s24, %s1659_s0 }
  0x1d   : > { %p1194_p0 = scmp.ne.s32.totalorder %s1422_s24, %s1193_s15  ;;  %p1200_p5 = scmp.lt.u32.totalorder %s1198_s14, %s1193_s15 }
  0x1e   : > { %p1202_p8 = scmp.lt.u32.totalorder %s1193_s15, %s1422_s24 }
  0x1f   : > { %p1196_p2 = pnand %p1195_p1, %p1194_p0  ;;  %p1201_p7 = por %p1200_p5, %p1199_p4 }
  0x21   : > { %p1197_p3 = pneg %p1196_p2  ;;  %p1203_p10 = por %p1202_p8, %p1201_p7 }
  0x23   : > { %p1204_p9 = pnand %p1203_p10, %p1197_p3 }
  0x25   : > { %1207 = shalt.err (!%p1204_p9)
}
  0x26   : > { %s1208_s12 = scalar_lea.vmem %s1430_s25, 128  ;;  %s1291_s13 = smov [#allocation2]  }
  0x27   : > { %p1209_p0 = scmp.ne.s32.totalorder %s1430_s25, %s1208_s12  ;;  %s1213_s27 = sshll.u32 %s1291_s13, 4  ;;  %s1214_s27 = int_to_ptr.vmem [resolvable:$false] %s1213_s27 }
  0x28   : > { %s1215_s16 = scalar_lea.vmem %s1214_s27, 256  ;;  %p1216_p11 = scmp.lt.s32.totalorder %s1430_s25, %s1214_s27 }
  0x29   : > { %p1211_p2 = pnand %p1209_p0, %p1195_p1  ;;  %p1217_p4 = scmp.lt.s32.totalorder %s1215_s16, %s1208_s12 }
  0x2b   : > { %p1212_p12 = pneg %p1211_p2  ;;  %p1218_p5 = por %p1217_p4, %p1216_p11 }
  0x2d   : > { %p1219_p7 = pnand %p1218_p5, %p1212_p12 }
  0x2f   : > { %1222 = shalt.err (!%p1219_p7)
}
  0x30   : > { %s1292_s15 = smov 64   ;;  %s1293_s14 = smov 4  }
  0x31   : > { %1125 = dma.hbm_to_vmem [thread:$0]  (!%p1426_p13), %s1422_s24, 128, %s1430_s25, %s1432_s19, %s1292_s15, %s1292_s15, %s1293_s14  }
  0x32   : > { %p984_p9 = scmp.ge.s32.totalorder %s1289_s20, 1  ;;  %p367_p1 = scmp.lt.s32.totalorder %s1289_s20, 3 }
  0x34   : > { %p368_p3 = pnand %p984_p9, %p367_p1 }
  0x35   : > { %s1463_s22 = sand.u32 (!%p368_p3), 1, %s1281_s18  }
  0x36   : > { %371 = sbr.rel (%p368_p3) target bundleno = 969 (0x3c9), region = 64  ;;  %s985_s12 = sshll.u32 (!%p368_p3), %s1463_s22, 3 }
  0x37   : > { %s374_s13 = scalar_lea.sflag (!%p368_p3), [#allocation3], %s1463_s22  ;;  %s377_s27 = scalar_lea.vmem (!%p368_p3), [#allocation2], %s985_s12 }
  0x3d   : > { %1268 = dma.done.wait (%p1402_p6), %s374_s13, 128  }
  0x3e   : > { %1270 = vsyncadd (%p1402_p6), %s374_s13, 4294967168  ;;  %s987_s19 = sshll.u32 %s1380_s21, 1  ;;  %v1294_v0 = vmov 0.0   ;;  %vm1295_vm0 = vmmov 0   ;;  %v1170_v1 = vld [vmem:[%s1638_s2] sm:$0xff]   ;;  %v1171_v2 = vld [vmem:[%s1638_s2 + $0x8] sm:$0xff]  }
  0x3f   : > { %1054 = vmatprep.subr.bf16.mxu0 %v1294_v0  ;;  %1060 = vmatprep.mubr.msk.bf16.mxu0 %vm1295_vm0, %v1294_v0  ;;  %p423_p11 = scmp.lt.s32.totalorder %s987_s19, 3  ;;  %vm540_vm1 = vcmask 1041408   ;;  %v1172_v3 = vld [vmem:[%s1638_s2 + $0x10] sm:$0xff]   ;;  %v530_v4 = vld [vmem:[%s1641_s5] sm:$0x3]  ;;  %vm536_vm2 = vcmask 31744  }
  0x40   : > { %1064 = vmatprep.subr.bf16.mxu1 %v1294_v0  ;;  %1066 = vmatprep.mubr.msk.bf16.mxu1 %vm1295_vm0, %v1294_v0  ;;  %v542_v5 = vsel %vm540_vm1, %v530_v4, 0  ;;  %v1175_v7 = vld [vmem:[%s1640_s4] sm:$0xff]   ;;  %vm468_vm3 = vcmask 392192   ;;  %v1176_v9 = vld [vmem:[%s1640_s4 + $0x8] sm:$0xff]   ;;  %v1177_v10 = vld [vmem:[%s1640_s4 + $0x10] sm:$0xff]   ;;  %vm621_vm4 = vcmask 785408  }
  0x41   : > { %s1669_s19 = smov (!%p423_p11, %s987_s19), 3  ;;  %1055 = vmatpush3.bf16.msra.mxu0 %v1170_v1  ;;  %1065 = vmatpush3.bf16.msra.mxu1 %v542_v5  ;;  %v1173_v8 = vld [vmem:[%s377_s27] sm:$0xff]   ;;  %v1178_v11 = vld [vmem:[%s1640_s4 + $0x18] sm:$0xff]   ;;  %v1183_v16 = vld [vmem:[%s1643_s7 + $0x10] sm:$0xff]   ;;  %vm832_vm5 = vcmask 523264   ;;  %s1026_s15 = sshll.u32 %s1380_s21, 8 }
  0x42   : > { %s988_s26 = sshll.u32 %s1669_s19, 2  ;;  %1056 = vmatprep.subr.bf16.mxu0 %v1294_v0  ;;  %1070 = vmatprep.subr.bf16.mxu1 %v1294_v0  ;;  %v1179_v12 = vld [vmem:[%s1640_s4 + $0x20] sm:$0xff]   ;;  %v1180_v13 = vld [vmem:[%s1640_s4 + $0x28] sm:$0xff]   ;;  %v1184_v17 = vld [vmem:[%s1643_s7 + $0x18] sm:$0xff]   ;;  %s1592_s13 = scalar_lea.hbm %s1647_s11, %s1026_s15 }
  0x43   : > { %s426_s12 = scalar_lea.vmem %s1637_s1, %s988_s26  ;;  %v1181_v14 = vld [vmem:[%s1643_s7] sm:$0xff]   ;;  %v1182_v15 = vld [vmem:[%s1643_s7 + $0x8] sm:$0xff]   ;;  %v1187_v34 = vld [vmem:[%s1643_s7 + $0x30] sm:$0xff]   ;;  %s986_s26 = sshll.u32 %s1463_s22, 4 }
  0x44   : > { %v1174_v6 = vld [vmem:[%s426_s12] sm:$0xff]   ;;  %v1186_v33 = vld [vmem:[%s1643_s7 + $0x28] sm:$0xff]   ;;  %v1188_v35 = vld [vmem:[%s1643_s7 + $0x38] sm:$0xff]   ;;  %s420_s27 = scalar_lea.vmem [#allocation5], %s986_s26  ;;  %s880_s19 = scalar_lea.sflag [#allocation4], %s1463_s22 }
  0x45   : > { %1057 = vmatpush3.bf16.msra.mxu0 %v1171_v2  ;;  %1067 = vmatmul.mubr.msk.bf16.vlgmr.msra.gmra.mrb[0].mxu1 %vm536_vm2, %v1174_v6  ;;  %v1185_v18 = vld [vmem:[%s1643_s7 + $0x20] sm:$0xff]   ;;  %v1190_v37 = vld [vmem:[%s1645_s9 + $0x8] sm:$0xff]   ;;  %v1191_v50 = vld [vmem:[%s1645_s9 + $0x10] sm:$0xff]   ;;  %s893_s16 = sshll.u32 %s420_s27, 4  ;;  %p1661_p12 = scmp.ne.s32.totalorder %s1657_s29, 0  ;;  %s1587_s16 = int_to_ptr.vmem [resolvable:$true] %s893_s16 }
  0x46   : > { %1058 = vmatprep.subr.bf16.mxu0 %v1294_v0  ;;  %1071 = vmatpush3.bf16.msra.mxu1 %v1175_v7  ;;  %v989_v21 = vld [vmem:[%s1639_s3] ss:$0 sm:$0xff]  ;;  %v1192_v51 = vld [vmem:[%s1645_s9 + $0x18] sm:$0xff]   ;;  %s1223_s21 = scalar_lea.vmem %s1587_s16, 256  ;;  %s1296_s24 = smov [#allocation5]  }
  0x47   : > { %1072 = vmatprep.subr.bf16.mxu1 %v1294_v0  ;;  %1082 = vmatprep.mubr.msk.bf16.mxu1 %vm1295_vm0, %v1294_v0  ;;  %v1189_v36 = vld [vmem:[%s1645_s9] sm:$0xff]   ;;  %p1224_p6 = scmp.ne.s32.totalorder %s1587_s16, %s1223_s21  ;;  %s1227_s28 = sshll.u32 %s1296_s24, 4  ;;  %s1228_s28 = int_to_ptr.vmem [resolvable:$false] %s1227_s28 }
  0x48   : > { %v1004_v39 = vld [vmem:[%s1642_s6] ss:$0 sm:$0xff]  ;;  %s1229_s0 = scalar_lea.vmem %s1228_s28, 512  ;;  %p1230_p10 = scmp.lt.s32.totalorder %s1587_s16, %s1228_s28 }
  0x49   : > { %1059 = vmatpush3.bf16.msra.mxu0 %v1172_v3  ;;  %v1005_v52 = vld [vmem:[%s1644_s8] ss:$0 sm:$0xff]  ;;  %p1225_p13 = pnand %p1224_p6, %p1661_p12  ;;  %p1231_p0 = scmp.lt.s32.totalorder %s1229_s0, %s1223_s21 }
  0x4a   : > { %1086 = vmatprep.subr.bf16.mxu0 %v1294_v0  ;;  %1073 = vmatpush3.bf16.msra.mxu1 %v1176_v9  ;;  %v1014_v62 = vld [vmem:[%s1646_s10] ss:$0 sm:$0xff] }
  0x4b   : > { %1074 = vmatprep.subr.bf16.mxu1 %v1294_v0  ;;  %p1226_p8 = pneg %p1225_p13  ;;  %p1232_p2 = por %p1231_p0, %p1230_p10 }
  0x4c   : > { %1061 = vmatmul.mubr.msk.bf16.vlgmr.msra.gmra.mrb[0].mxu0 %vm468_vm3, %v1173_v8 }
  0x4d   : > { %1102 = vmatprep.mubr.msk.bf16.mxu0 %vm1295_vm0, %v1294_v0  ;;  %1087 = vmatpush3.bf16.msra.mxu0 %v1181_v14  ;;  %p1233_p4 = pnand %p1232_p2, %p1226_p8 }
  0x4e   : > { %1075 = vmatpush3.bf16.msra.mxu1 %v1177_v10  ;;  %1088 = vmatprep.subr.bf16.mxu0 %v1294_v0 }
  0x4f   : > { %1076 = vmatprep.subr.bf16.mxu1 %v1294_v0 }
  0x51   : > { %1089 = vmatpush3.bf16.msra.mxu0 %v1182_v15 }
  0x52   : > { %1077 = vmatpush3.bf16.msra.mxu1 %v1178_v11  ;;  %1090 = vmatprep.subr.bf16.mxu0 %v1294_v0 }
  0x53   : > { %1078 = vmatprep.subr.bf16.mxu1 %v1294_v0 }
  0x55   : > { %1091 = vmatpush3.bf16.msra.mxu0 %v1183_v16 }
  0x56   : > { %1079 = vmatpush3.bf16.msra.mxu1 %v1179_v12  ;;  %1092 = vmatprep.subr.bf16.mxu0 %v1294_v0 }
  0x57   : > { %1080 = vmatprep.subr.bf16.mxu1 %v1294_v0 }
  0x59   : > { %1093 = vmatpush3.bf16.msra.mxu0 %v1184_v17 }
  0x5a   : > { %1081 = vmatpush3.bf16.msra.mxu1 %v1180_v13  ;;  %1094 = vmatprep.subr.bf16.mxu0 %v1294_v0 }
  0x5b   : > { %1106 = vmatprep.subr.bf16.mxu1 %v1294_v0 }
  0x5d   : > { %1095 = vmatpush3.bf16.msra.mxu0 %v1185_v18 }
  0x5e   : > { %1096 = vmatprep.subr.bf16.mxu0 %v1294_v0 }
  0x61   : > { %1097 = vmatpush3.bf16.msra.mxu0 %v1186_v33 }
  0x62   : > { %1098 = vmatprep.subr.bf16.mxu0 %v1294_v0 }
  0x65   : > { %1099 = vmatpush3.bf16.msra.mxu0 %v1187_v34 }
  0x66   : > { %1100 = vmatprep.subr.bf16.mxu0 %v1294_v0 }
  0x69   : > { %1101 = vmatpush3.bf16.msra.mxu0 %v1188_v35 }
 0x118   : > { %v578_v19 = vpop.f32.mrb[0].mxu1 }
 0x119   : > { %v1068_v20 = vpop.f32.mrb[1].mxu1 }
 0x11a   : > { %v581_v22 = vpop.f32.mrb[2].mxu1 }
 0x11b   : > { %v1069_v23 = vpop.f32.mrb[3].mxu1 }
 0x11f   : > { %v506_v24 = vpop.f32.mrb[0].mxu0 }
 0x120   : > { %v507_v25 = vadd.f32 %v989_v21, %v506_v24  ;;  %v1062_v26 = vpop.f32.mrb[1].mxu0 }
 0x121   : > { %v509_v27 = vpop.f32.mrb[2].mxu0 }
 0x122   : > { %v510_v28 = vadd.f32 %v989_v21, %v509_v27  ;;  %v1063_v29 = vpop.f32.mrb[3].mxu0  ;;  %v513_v30 = vmax.f32 %v507_v25, 0.0 }
 0x124   : > { %v514_v31 = vmax.f32 %v510_v28, 0.0 }
 0x126   : > { %v515_v32 = vpack.c.bf16 %v514_v31, %v513_v30 }
 0x128   : > { %1083 = vmatmul.mubr.msk.bf16.vlgmr.msra.gmra.mrb[4].mxu1 %vm621_vm4, %v515_v32 }
 0x129   : > { %1114 = vmatprep.mubr.msk.bf16.mxu1 %vm1295_vm0, %v1294_v0  ;;  %1107 = vmatpush3.bf16.msra.mxu1 %v1189_v36 }
 0x12a   : > { %1108 = vmatprep.subr.bf16.mxu1 %v1294_v0 }
 0x12d   : > { %1109 = vmatpush3.bf16.msra.mxu1 %v1190_v37 }
 0x12e   : > { %1110 = vmatprep.subr.bf16.mxu1 %v1294_v0 }
 0x131   : > { %1111 = vmatpush3.bf16.msra.mxu1 %v1191_v50 }
 0x132   : > { %1112 = vmatprep.subr.bf16.mxu1 %v1294_v0 }
 0x135   : > { %1113 = vmatpush3.bf16.msra.mxu1 %v1192_v51 }
 0x1fb   : > { %v659_v38 = vpop.f32.mrb[4].mxu1 }
 0x1fc   : > { %v660_v40 = vadd.f32 %v659_v38, %v578_v19  ;;  %v1084_v41 = vpop.f32.mrb[5].mxu1 }
 0x1fd   : > { %v662_v42 = vpop.f32.mrb[6].mxu1 }
 0x1fe   : > { %v673_v43 = vadd.f32 %v1004_v39, %v660_v40  ;;  %v663_v44 = vadd.f32 %v662_v42, %v581_v22  ;;  %v1085_v45 = vpop.f32.mrb[7].mxu1 }
 0x200   : > { %v674_v46 = vadd.f32 %v1004_v39, %v663_v44  ;;  %v675_v47 = vmax.f32 %v673_v43, 0.0 }
 0x202   : > { %v676_v48 = vmax.f32 %v674_v46, 0.0 }
 0x204   : > { %v677_v49 = vpack.c.bf16 %v676_v48, %v675_v47 }
 0x206   : > { %1103 = vmatmul.mubr.bf16.vlgmr.msra.gmra.mrb[4].mxu0 %v677_v49 }
 0x2d9   : > { %v783_v53 = vpop.f32.mrb[4].mxu0 }
 0x2da   : > { %v784_v54 = vadd.f32 %v1005_v52, %v783_v53  ;;  %v1104_v55 = vpop.f32.mrb[5].mxu0 }
 0x2db   : > { %v786_v56 = vpop.f32.mrb[6].mxu0 }
 0x2dc   : > { %v787_v57 = vadd.f32 %v1005_v52, %v786_v56  ;;  %v1105_v58 = vpop.f32.mrb[7].mxu0  ;;  %v790_v59 = vmax.f32 %v784_v54, 0.0 }
 0x2de   : > { %v791_v60 = vmax.f32 %v787_v57, 0.0 }
 0x2e0   : > { %v792_v61 = vpack.c.bf16 %v791_v60, %v790_v59 }
 0x2e2   : > { %1115 = vmatmul.mubr.msk.bf16.vlgmr.msra.gmra.mrb[8].mxu1 %vm832_vm5, %v792_v61 }
 0x3b5   : > { %v870_v63 = vpop.f32.mrb[8].mxu1 }
 0x3b6   : > { %v871_v0 = vadd.f32 %v1014_v62, %v870_v63  ;;  %v1116_v1 = vpop.f32.mrb[9].mxu1 }
 0x3b7   : > { %v873_v2 = vpop.f32.mrb[10].mxu1 }
 0x3b8   : > { %877 = vst [vmem:[%s420_s27] sm:$0xff] %v871_v0  ;;  %v874_v3 = vadd.f32 %v1014_v62, %v873_v2  ;;  %v1117_v4 = vpop.f32.mrb[11].mxu1 }
 0x3ba   : > { %878 = vst [vmem:[%s420_s27 + $0x8] sm:$0xff] %v874_v3 }
 0x3bb   : > { %1236 = shalt.err (!%p1233_p4)
}
 0x3bc   : > { %s1237_s26 = scalar_lea.hbm %s1592_s13, 256  ;;  %s1241_s27 = scalar_lea.hbm %s1647_s11, 512 }
 0x3bd   : > { %p1238_p5 = scmp.ne.s32.totalorder %s1592_s13, %s1237_s26  ;;  %p1242_p1 = scmp.lt.u32.totalorder %s1592_s13, %s1647_s11 }
 0x3be   : > { %p1243_p3 = scmp.lt.u32.totalorder %s1241_s27, %s1237_s26  ;;  %p1245_p6 = scmp.lt.u32.totalorder %s1237_s26, %s1592_s13 }
 0x3bf   : > { %p1239_p7 = pnand %p1238_p5, %p1661_p12 }
 0x3c0   : > { %p1244_p11 = por %p1243_p3, %p1242_p1 }
 0x3c1   : > { %p1240_p9 = pneg %p1239_p7 }
 0x3c2   : > { %p1246_p13 = por %p1245_p6, %p1244_p11 }
 0x3c4   : > { %p1247_p8 = pnand %p1246_p13, %p1240_p9 }
 0x3c6   : > { %1250 = shalt.err (!%p1247_p8)
}
 0x3c7   : > { %s1297_s12 = smov 128   ;;  %s1298_s21 = smov 8  }
 0x3c8   : > { %1120 = dma.vmem_to_hbm [thread:$0]  (%p1661_p12), %s1587_s16, 256, %s1592_s13, %s880_s19, %s1297_s12, %s1297_s12, %s1298_s21  }
 0x3c9 PF: > { %s908_s24 = sand.u32 1, %s1277_s17   ;;  %p1662_p10 = scmp.ne.s32.totalorder %s1658_s30, 0 }
 0x3ca   : > { %p1663_p0 = scmp.ge.s32.totalorder %s1289_s20, 2  ;;  %s909_s28 = scalar_lea.sflag [#allocation4], %s908_s24 }
 0x3cc   : > { %p1127_p2 = pnand %p1663_p0, %p1662_p10 }
 0x3ce   : > { %1272 = dma.done.wait (!%p1127_p2), %s909_s28, 256  }
 0x3cf   : > { %1274 = vsyncadd (!%p1127_p2), %s909_s28, 4294967040  ;;  %s1664_s17 = sld [smem:[#allocation8_spill]]  ;;  %s1665_s18 = sld [smem:[#allocation9_spill]] }
 0x3d0   : > { %s1666_s19 = sld [smem:[#allocation10_spill]]  ;;  %p24_p4 = scmp.ge.s32.totalorder %s1384_s23, 4  }
 0x3d1   : > { %s1667_s20 = smov %s1384_s23 }
 0x3d2   :  { %26 = sbr.rel (!%p24_p4) target bundleno = 7 (0x7), region = 112 }
 0x3d9   :  { %914 = vsyncpa [#allocation3], 1 }
 0x3da   :  { %916 = vsyncpa [#allocation3 + $0x1], 1 }
 0x3db   :  { %917 = vsyncpa [#allocation4], 1 }
 0x3dc   :  { %919 = vsyncpa [#allocation4 + $0x1], 1 }

</bundles_post_ra>
